<compile_context>
chip_gen: v6e
topology: v6e:2x2x1
jax: 0.10.0
libtpu: 0.0.40
codegen_flags: <defaults>
</compile_context>

<pallas_src>
import functools

import jax
import jax.numpy as jnp
from jax.experimental import pallas as pl
from jax.experimental.pallas import tpu as pltpu


def _projector_pool_kernel(len_ref,                  # scalar prefetch: int32 [B] (SMEM)
                           x_ref, wp_ref, bp_ref,    # inputs
                           proj_ref, psum_ref,       # outputs
                           acc_ref):                 # VMEM scratch (1, Dp) f32
    """Grid = (S, B, TPS): S = time splits (parallel), B = batch (parallel),
    TPS = time tiles per split (arbitrary reduction axis).

    x_ref    : (1, TT, D_up)     f32/bf16  time tile of batch element b
    wp_ref   : (D_up, D_proj)    bf16      projector weight
    bp_ref   : (1, D_proj)       f32       projector bias
    proj_ref : (1, TT, D_proj)   bf16      projected features (written every step)
    psum_ref : (1, 1, 1, D_proj) f32       masked partial sum for (b, s) (written at last tile)
    acc_ref  : (1, D_proj)       f32       running masked sum across this split's time tiles
    """
    s = pl.program_id(0)
    b = pl.program_id(1)
    t = pl.program_id(2)
    tps = pl.num_programs(2)
    tt = x_ref.shape[1]

    @pl.when(t == 0)
    def _():
        acc_ref[...] = jnp.zeros_like(acc_ref)

    # --- projector: (TT, D_up) @ (D_up, D_proj) on the MXU, bf16 operands, f32 accumulate.
    # The f32 -> bf16 cast happens here in VMEM (no separate HBM pass in the wrapper).
    x = x_ref[0].astype(wp_ref.dtype)                                     # (TT, D_up)
    proj = jnp.dot(x, wp_ref[...], preferred_element_type=jnp.float32) + bp_ref[...]
    proj_ref[0] = proj.astype(proj_ref.dtype)                             # bf16 writeback

    # --- length-masked partial sum: VPU multiply + XLU sublane reduce (no second matmul,
    #     Wp stays stationary in the MXU across all time tiles).
    frame0 = (s * tps + t) * tt
    frame = frame0 + jax.lax.broadcasted_iota(jnp.int32, (tt, 1), 0)      # global frame ids
    mask = (frame < len_ref[b]).astype(jnp.float32)                       # (TT, 1)
    acc_ref[...] += jnp.sum(proj * mask, axis=0, keepdims=True)           # (1, D_proj)

    @pl.when(t == tps - 1)
    def _():
        psum_ref[0, 0] = acc_ref[...]


def downstream_expert_forward(features, features_len, labels, params, *,
                              time_tile=512, time_splits=2,
                              compute_dtype=jnp.bfloat16):
    """JAX wrapper mirroring DownstreamExpert.forward (no-augmentation branch).

    features: (B, T, D_up) padded batch (pad_sequence(batch_first=True)); f32 or bf16.
    Set compute_dtype=jnp.float32 to bit-match the f32 PyTorch Linear (at ~2x HBM cost).
    `features_projected` is returned in compute_dtype.
    """
    B, T, Dup = features.shape
    Wp = params["w_proj"]          # (D_up, D_proj)
    bp = params["b_proj"]          # (D_proj,)
    Wc = params["w_cls"]           # (D_proj, C)
    bc = params["b_cls"]           # (C,)
    Dp = Wp.shape[1]

    # Lane-dense projector output: pad D_proj to a multiple of 128 (no-op for typical dims).
    Dpp = -(-Dp // 128) * 128
    if Dpp != Dp:
        Wp = jnp.pad(Wp, ((0, 0), (0, Dpp - Dp)))
        bp = jnp.pad(bp, (0, Dpp - Dp))

    # Balanced, 16-aligned time tiles; tile count divisible by time_splits so every split
    # owns an equal chunk.  When T is a multiple of 16 this gives t_pad == T, i.e. no
    # wrapper-side pad and no output slice-copy.
    S = max(1, int(time_splits))
    ntiles = max(1, -(-T // max(16, int(time_tile))))
    ntiles = -(-ntiles // S) * S
    tt = -(-T // ntiles)
    tt = -(-tt // 16) * 16
    t_pad = ntiles * tt
    tps = ntiles // S

    x = features
    if t_pad != T:
        # TODO(synk): only taken when T is not tileable exactly (one extra HBM pass);
        # upstream batching can avoid it by padding utterances to a multiple of 16 frames.
        x = jnp.pad(x, ((0, 0), (0, t_pad - T), (0, 0)))

    wp = Wp.astype(compute_dtype)                       # tiny one-off weight cast
    bp2 = bp.reshape(1, Dpp).astype(jnp.float32)
    lens = features_len.astype(jnp.int32)

    # Double-buffered VMEM footprint estimate -> scoped-VMEM limit (v7x: 64 MiB physical).
    in_b = jnp.dtype(x.dtype).itemsize
    cd_b = jnp.dtype(compute_dtype).itemsize
    vmem_est = 2 * (tt * Dup * in_b + tt * Dpp * cd_b + Dup * Dpp * cd_b + 3 * Dpp * 4)
    vmem_limit = int(min(64 * 2 ** 20, max(2 * vmem_est, 16 * 2 ** 20)))

    proj_pad, psum = pl.pallas_call(
        _projector_pool_kernel,
        out_shape=(
            jax.ShapeDtypeStruct((B, t_pad, Dpp), compute_dtype),   # projected features
            jax.ShapeDtypeStruct((B, S, 1, Dpp), jnp.float32),      # masked partial sums
        ),
        grid_spec=pltpu.PrefetchScalarGridSpec(
            num_scalar_prefetch=1,
            grid=(S, B, tps),
            in_specs=[
                pl.BlockSpec((1, tt, Dup), lambda s, b, t, lr: (b, s * tps + t, 0)),
                pl.BlockSpec((Dup, Dpp), lambda s, b, t, lr: (0, 0)),
                pl.BlockSpec((1, Dpp), lambda s, b, t, lr: (0, 0)),
            ],
            out_specs=[
                pl.BlockSpec((1, tt, Dpp), lambda s, b, t, lr: (b, s * tps + t, 0)),
                pl.BlockSpec((1, 1, 1, Dpp), lambda s, b, t, lr: (b, s, 0, 0)),
            ],
            scratch_shapes=[pltpu.VMEM((1, Dpp), jnp.float32)],
        ),
        compiler_params=pltpu.CompilerParams(
            dimension_semantics=("parallel", "parallel", "arbitrary"),
            vmem_limit_bytes=vmem_limit),
    )(lens, x, wp, bp2)

    proj = proj_pad if t_pad == T else proj_pad[:, :T, :]
    pooled_sum = jnp.sum(psum[:, :, 0, :], axis=1)              # (B, Dpp) f32, tiny
    if Dpp != Dp:
        proj = proj[..., :Dp]
        pooled_sum = pooled_sum[:, :Dp]
    denom = jnp.maximum(lens, 1).astype(jnp.float32)[:, None]   # zero-length -> denom 1
    pooled = pooled_sum / denom                                  # (B, Dp) masked mean pool

    # Classifier head: one tiny (B, Dp) x (Dp, C) GEMM, done once outside the grid loop.
    predicted = jnp.dot(pooled, Wc) + bc

    # Per-utterance glue (B x C = tiny): CrossEntropyLoss, softmax scores, argmax.
    logp = jax.nn.log_softmax(predicted, axis=-1)
    loss = -jnp.mean(jnp.take_along_axis(logp, labels[:, None], axis=-1))
    score = jax.nn.softmax(predicted, axis=-1)
    predicted_classid = jnp.argmax(predicted, axis=-1)
    acc = (predicted_classid == labels).astype(jnp.float32)

    return {
        "loss": loss,
        "predicted": predicted,
        "features_pooled": pooled,
        "features_projected": proj,
        "score": score,
        "predicted_classid": predicted_classid,
        "acc": acc,
    }


def init_params(key, upstream_dim, projector_dim, num_classes):
    k1, k2, k3, k4 = jax.random.split(key, 4)
    s_p = 1.0 / jnp.sqrt(upstream_dim)
    s_c = 1.0 / jnp.sqrt(projector_dim)
    return {
        "w_proj": jax.random.uniform(k1, (upstream_dim, projector_dim), jnp.float32, -s_p, s_p),
        "b_proj": jax.random.uniform(k2, (projector_dim,), jnp.float32, -s_p, s_p),
        "w_cls": jax.random.uniform(k3, (projector_dim, num_classes), jnp.float32, -s_c, s_c),
        "b_cls": jax.random.uniform(k4, (num_classes,), jnp.float32, -s_c, s_c),
    }


if __name__ == "__main__":
    B, T, UPSTREAM_DIM, PROJECTOR_DIM, NUM_CLASSES = 4, 320, 256, 128, 2

    key = jax.random.PRNGKey(0)
    k_feat, k_param = jax.random.split(key)

    # Padded feature batch (as produced by pad_sequence(batch_first=True)).
    features = jax.random.normal(k_feat, (B, T, UPSTREAM_DIM), jnp.float32)
    features_len = jnp.array([320, 260, 200, 64], dtype=jnp.int32)
    frame_ids = jnp.arange(T)[None, :, None]
    features = jnp.where(frame_ids < features_len[:, None, None], features, 0.0)

    labels = jnp.array([1, 0, 1, 0], dtype=jnp.int32)
    params = init_params(k_param, UPSTREAM_DIM, PROJECTOR_DIM, NUM_CLASSES)

    # time_tile=96 -> 4 balanced 80-frame tiles (t_pad == T: no pad, no slice copies);
    # time_splits=2 -> two parallel time chunks per utterance (keeps both v7x TCs busy).
    fwd = jax.jit(functools.partial(downstream_expert_forward,
                                    time_tile=96, time_splits=2))
    out = fwd(features, features_len, labels, params)
    jax.block_until_ready(out)

    assert out["predicted"].shape == (B, NUM_CLASSES)
    assert out["features_pooled"].shape == (B, PROJECTOR_DIM)
    assert out["features_projected"].shape == (B, T, PROJECTOR_DIM)
    assert out["score"].shape == (B, NUM_CLASSES)
    assert out["predicted_classid"].shape == (B,)
    assert bool(jnp.isfinite(out["loss"]))

    # Numerical check against a pure-JAX f32 reference (tolerances sized for bf16 matmul).
    proj_ref = features @ params["w_proj"] + params["b_proj"]
    mask = (frame_ids < features_len[:, None, None]).astype(jnp.float32)
    pooled_ref = (proj_ref * mask).sum(axis=1) / features_len[:, None].astype(jnp.float32)
    pred_ref = pooled_ref @ params["w_cls"] + params["b_cls"]
    assert bool(jnp.allclose(out["features_pooled"], pooled_ref, atol=5e-2, rtol=5e-2))
    assert bool(jnp.allclose(out["predicted"], pred_ref, atol=5e-2, rtol=5e-2))

    print("KERNEL_OK")
</pallas_src>

<mosaic_0001>
module attributes {stable_mosaic.version = 11 : i64} {
  func.func @_projector_pool_kernel(%arg0: i32, %arg1: i32, %arg2: i32, %arg3: memref<4xi32, #tpu.memory_space<smem>>, %arg4: memref<1x80x256xf32, #tpu.memory_space<vmem>>, %arg5: memref<256x128xbf16, #tpu.memory_space<vmem>>, %arg6: memref<1x128xf32, #tpu.memory_space<vmem>>, %arg7: memref<1x80x128xbf16, #tpu.memory_space<vmem>>, %arg8: memref<1x1x1x128xf32, #tpu.memory_space<vmem>>, %arg9: memref<1x128xf32, #tpu.memory_space<vmem>>) attributes {dimension_semantics = [#tpu.dimension_semantics<parallel>, #tpu.dimension_semantics<parallel>, #tpu.dimension_semantics<arbitrary>], iteration_bounds = array<i64: 2, 4, 2>, scalar_prefetch = 1 : i64, scratch_operands = 1 : i64, tpu.core_type = #tpu.core_type<tc>, window_params = [{transform_indices = @transform_0, window_bounds = array<i64: 1, 80, 256>}, {pipeline_mode = #tpu.pipeline_mode<synchronous>, transform_indices = @transform_1, window_bounds = array<i64: 256, 128>}, {pipeline_mode = #tpu.pipeline_mode<synchronous>, transform_indices = @transform_2, window_bounds = array<i64: 1, 128>}, {transform_indices = @transform_3, window_bounds = array<i64: 1, 80, 128>}, {transform_indices = @transform_4, window_bounds = array<i64: 1, 1, 1, 128>}]} {
    %c0_i32 = arith.constant 0 : i32
    %0 = arith.cmpi eq, %arg2, %c0_i32 : i32
    %1 = arith.extui %0 : i1 to i32
    %c0_i32_0 = arith.constant 0 : i32
    %2 = arith.cmpi ne, %1, %c0_i32_0 : i32
    scf.if %2 {
      %cst_16 = arith.constant 0.000000e+00 : f32
      %37 = vector.broadcast %cst_16 : f32 to vector<1x128xf32>
      %c0_17 = arith.constant 0 : index
      %c0_18 = arith.constant 0 : index
      %38 = vector.load %arg9[%c0_17, %c0_18] : memref<1x128xf32, #tpu.memory_space<vmem>>, vector<1x128xf32>
      tpu.vector_store %arg9[%c0_17, %c0_18], %37 {strides = array<i32>} : memref<1x128xf32, #tpu.memory_space<vmem>>, vector<1x128xf32>,
    } else {
    }
    %c0 = arith.constant 0 : index
    %c0_1 = arith.constant 0 : index
    %c0_2 = arith.constant 0 : index
    %3 = vector.load %arg4[%c0, %c0_1, %c0_2] : memref<1x80x256xf32, #tpu.memory_space<vmem>>, vector<1x80x256xf32>
    %4 = vector.shape_cast %3 : vector<1x80x256xf32> to vector<80x256xf32>
    %5 = arith.truncf %4 : vector<80x256xf32> to vector<80x256xbf16>
    %c0_3 = arith.constant 0 : index
    %c0_4 = arith.constant 0 : index
    %6 = vector.load %arg5[%c0_3, %c0_4] : memref<256x128xbf16, #tpu.memory_space<vmem>>, vector<256x128xbf16>
    %cst = arith.constant dense<0.000000e+00> : vector<80x128xf32>
    %7 = tpu.matmul %5, %6, %cst {dimension_numbers = #tpu.dot_dimension_numbers<[1], [0], [0], [1], [0, 0, 1, 1], [], []>} : vector<80x256xbf16>, vector<256x128xbf16>, vector<80x128xf32> -> vector<80x128xf32>
    %c0_5 = arith.constant 0 : index
    %c0_6 = arith.constant 0 : index
    %8 = vector.load %arg6[%c0_5, %c0_6] : memref<1x128xf32, #tpu.memory_space<vmem>>, vector<1x128xf32>
    %9 = vector.broadcast %8 : vector<1x128xf32> to vector<80x128xf32>
    %10 = arith.addf %7, %9 : vector<80x128xf32>
    %11 = arith.truncf %10 : vector<80x128xf32> to vector<80x128xbf16>
    %c0_7 = arith.constant 0 : index
    %c0_8 = arith.constant 0 : index
    %c0_9 = arith.constant 0 : index
    %12 = vector.load %arg7[%c0_7, %c0_8, %c0_9] : memref<1x80x128xbf16, #tpu.memory_space<vmem>>, vector<1x80x128xbf16>
    %13 = vector.shape_cast %12 : vector<1x80x128xbf16> to vector<80x128xbf16>
    %14 = vector.shape_cast %11 : vector<80x128xbf16> to vector<1x80x128xbf16>
    tpu.vector_store %arg7[%c0_7, %c0_8, %c0_9], %14 {strides = array<i32>} : memref<1x80x128xbf16, #tpu.memory_space<vmem>>, vector<1x80x128xbf16>,
    %c2_i32 = arith.constant 2 : i32
    %15 = arith.muli %arg0, %c2_i32 : i32
    %16 = arith.addi %15, %arg2 : i32
    %c80_i32 = arith.constant 80 : i32
    %17 = arith.muli %16, %c80_i32 : i32
    %18 = tpu.iota {dimensions = array<i32: 0>} : vector<80x1xi32>
    %19 = vector.broadcast %17 : i32 to vector<80x1xi32>
    %20 = arith.addi %19, %18 : vector<80x1xi32>
    %21 = arith.index_cast %arg1 : i32 to index
    %22 = memref.load %arg3[%21] : memref<4xi32, #tpu.memory_space<smem>>
    %23 = vector.broadcast %22 : i32 to vector<80x1xi32>
    %24 = arith.cmpi slt, %20, %23 : vector<80x1xi32>
    %25 = arith.extui %24 : vector<80x1xi1> to vector<80x1xi32>
    %26 = arith.sitofp %25 : vector<80x1xi32> to vector<80x1xf32>
    %c0_10 = arith.constant 0 : index
    %c0_11 = arith.constant 0 : index
    %27 = vector.load %arg9[%c0_10, %c0_11] : memref<1x128xf32, #tpu.memory_space<vmem>>, vector<1x128xf32>
    %28 = vector.broadcast %26 : vector<80x1xf32> to vector<80x128xf32>
    %29 = arith.mulf %10, %28 : vector<80x128xf32>
    %cst_12 = arith.constant dense<0.000000e+00> : vector<128xf32>
    %30 = vector.multi_reduction <add>, %29, %cst_12 [0] : vector<80x128xf32> to vector<128xf32>
    %31 = vector.shape_cast %30 : vector<128xf32> to vector<1x128xf32>
    %32 = arith.addf %27, %31 : vector<1x128xf32>
    %c0_13 = arith.constant 0 : index
    %c0_14 = arith.constant 0 : index
    %33 = vector.load %arg9[%c0_13, %c0_14] : memref<1x128xf32, #tpu.memory_space<vmem>>, vector<1x128xf32>
    tpu.vector_store %arg9[%c0_13, %c0_14], %32 {strides = array<i32>} : memref<1x128xf32, #tpu.memory_space<vmem>>, vector<1x128xf32>,
    %c1_i32 = arith.constant 1 : i32
    %34 = arith.cmpi eq, %arg2, %c1_i32 : i32
    %35 = arith.extui %34 : i1 to i32
    %c0_i32_15 = arith.constant 0 : i32
    %36 = arith.cmpi ne, %35, %c0_i32_15 : i32
    scf.if %36 {
      %c0_16 = arith.constant 0 : index
      %c0_17 = arith.constant 0 : index
      %37 = vector.load %arg9[%c0_16, %c0_17] : memref<1x128xf32, #tpu.memory_space<vmem>>, vector<1x128xf32>
      %c0_18 = arith.constant 0 : index
      %c0_19 = arith.constant 0 : index
      %c0_20 = arith.constant 0 : index
      %c0_21 = arith.constant 0 : index
      %38 = vector.load %arg8[%c0_18, %c0_19, %c0_20, %c0_21] : memref<1x1x1x128xf32, #tpu.memory_space<vmem>>, vector<1x1x1x128xf32>
      %39 = vector.shape_cast %38 : vector<1x1x1x128xf32> to vector<1x128xf32>
      %40 = vector.shape_cast %37 : vector<1x128xf32> to vector<1x1x1x128xf32>
      tpu.vector_store %arg8[%c0_18, %c0_19, %c0_20, %c0_21], %40 {strides = array<i32>} : memref<1x1x1x128xf32, #tpu.memory_space<vmem>>, vector<1x1x1x128xf32>,
    } else {
    }
    return
  }
  func.func @transform_0(%arg0: i32, %arg1: i32, %arg2: i32, %arg3: memref<4xi32, #tpu.memory_space<smem>>) -> (i32, i32, i32) {
    %c2_i32 = arith.constant 2 : i32
    %0 = arith.muli %arg0, %c2_i32 : i32
    %1 = arith.addi %0, %arg2 : i32
    %c0_i32 = arith.constant 0 : i32
    %c0_i32_0 = arith.constant 0 : i32
    return %arg1, %1, %c0_i32 : i32, i32, i32
  }
  func.func @transform_1(%arg0: i32, %arg1: i32, %arg2: i32, %arg3: memref<4xi32, #tpu.memory_space<smem>>) -> (i32, i32) {
    %c0_i32 = arith.constant 0 : i32
    %c0_i32_0 = arith.constant 0 : i32
    %c0_i32_1 = arith.constant 0 : i32
    return %c0_i32, %c0_i32_0 : i32, i32
  }
  func.func @transform_2(%arg0: i32, %arg1: i32, %arg2: i32, %arg3: memref<4xi32, #tpu.memory_space<smem>>) -> (i32, i32) {
    %c0_i32 = arith.constant 0 : i32
    %c0_i32_0 = arith.constant 0 : i32
    %c0_i32_1 = arith.constant 0 : i32
    return %c0_i32, %c0_i32_0 : i32, i32
  }
  func.func @transform_3(%arg0: i32, %arg1: i32, %arg2: i32, %arg3: memref<4xi32, #tpu.memory_space<smem>>) -> (i32, i32, i32) {
    %c2_i32 = arith.constant 2 : i32
    %0 = arith.muli %arg0, %c2_i32 : i32
    %1 = arith.addi %0, %arg2 : i32
    %c0_i32 = arith.constant 0 : i32
    %c0_i32_0 = arith.constant 0 : i32
    return %arg1, %1, %c0_i32 : i32, i32, i32
  }
  func.func @transform_4(%arg0: i32, %arg1: i32, %arg2: i32, %arg3: memref<4xi32, #tpu.memory_space<smem>>) -> (i32, i32, i32, i32) {
    %c0_i32 = arith.constant 0 : i32
    %c0_i32_0 = arith.constant 0 : i32
    %c0_i32_1 = arith.constant 0 : i32
    return %arg1, %arg0, %c0_i32, %c0_i32_0 : i32, i32, i32, i32
  }
}

</mosaic_0001>

<bundles_post_ra>
// kernel: downstream_expert_forward.1
= control target key start
LH: loop header
LB: loop body
LE: loop exit
PB: predicated region body
PF: predicated region fallthrough
CT: control target
= control target key end

     0   :  { %s1325_s18 = smov [#allocation4]   ;;  %s1744_s0 = inlined_call_operand.hbm [shape: s32[4], index: 0, kind: input, shape index: {}]   ;;  %s1745_s1 = inlined_call_operand.hbm [shape: f32[4,320,256], index: 1, kind: input, shape index: {}]   ;;  %s1746_s2 = inlined_call_operand.vmem [shape: bf16[256,128], index: 2, kind: input, shape index: {}]   ;;  %s1747_s3 = inlined_call_operand.hbm [shape: f32[1,128], index: 3, kind: input, shape index: {}]   ;;  %s1748_s4 = inlined_call_operand.hbm [shape: bf16[4,320,128], index: 4, kind: output, shape index: {0}]   ;;  %s1749_s5 = inlined_call_operand.vmem [shape: f32[4,2,1,128], index: 5, kind: output, shape index: {1}]  }
   0x1   :  { %1764 = sst [smem:[#allocation22_spill]] %s1746_s2 }
   0x2   :  { %1765 = sst [smem:[#allocation23_spill]] %s1747_s3 }
   0x3   :  { %1766 = sst [smem:[#allocation24_spill]] %s1748_s4 }
   0x4   :  { %12 = dma.hbm_to_smem %s1744_s0, 16, %s1325_s18, [#allocation3] }
   0x5   :  { %1271 = dma.done.wait [#allocation3], 16 }
   0x6   :  { %1272 = vsyncadd [#allocation3], 4294967280 }
   0x7   :  { %14 = sfence }
   0x8   :  { %15 = vsyncpa [#allocation6], 0 }
   0x9   :  { %17 = vsyncpa [#allocation6 + $0x1], 0 }
   0xa   :  { %18 = vsyncpa [#allocation9], 0 }
   0xb   :  { %19 = vsyncpa [#allocation7], 0 }
   0xc   :  { %21 = vsyncpa [#allocation7 + $0x1], 0  ;;  %s1368_s21 = smov 0   ;;  %s1370_s22 = smov 0  }
   0xd   :  { %s1372_s23 = smov 0   ;;  %s1374_s24 = smov 0  }
   0xe   :  { %s1376_s25 = smov 0   ;;  %s1378_s26 = smov 0  }
   0xf   :  { %s1380_s0 = smov 0   ;;  %s1382_s27 = smov 0  }
  0x10   :  { %s1384_s28 = smov 0   ;;  %s1386_s29 = smov 0  }
  0x11 LB: > { %1767 = sst [smem:[#allocation15_spill]] %s1287_s21  ;;  %s849_s30 = sadd.s32 4294967295, %s1323_s29   ;;  %s1323_s29 = sphi %s1386_s29, %s1803_s29   ;;  %s1319_s28 = sphi %s1384_s28, %s1802_s28   ;;  %s1315_s27 = sphi %s1382_s27, %s1801_s27   ;;  %s1311_s0 = sphi %s1380_s0, %s1800_s0   ;;  %s1307_s26 = sphi %s1378_s26, %s1795_s26   ;;  %s1303_s25 = sphi %s1376_s25, %s1799_s25   ;;  %s1299_s24 = sphi %s1374_s24, %s1794_s24   ;;  %s1295_s23 = sphi %s1372_s23, %s1798_s23   ;;  %s1291_s22 = sphi %s1370_s22, %s1797_s22   ;;  %s1287_s21 = sphi %s1368_s21, %s1796_s21  }
  0x12   : > { %1768 = sst [smem:[#allocation16_spill]] %s1299_s24  ;;  %s850_s6 = sadd.s32 4294967294, %s1323_s29  }
  0x13   : > { %1769 = sst [smem:[#allocation17_spill]] %s1311_s0  ;;  %p66_p0 = scmp.ne.s32.totalorder %s1295_s23, %s1291_s22 }
  0x14   : > { %1770 = sst [smem:[#allocation18_spill]] %s1319_s28  ;;  %p67_p1 = scmp.eq.s32.totalorder %s1323_s29, 0 }
  0x15   : > { %1771 = sst [smem:[#allocation19_spill]] %s1323_s29  ;;  %p72_p2 = scmp.ne.s32.totalorder %s1291_s22, %s1287_s21 }
  0x16   : > { %p1425_p3 = scmp.eq.s32.totalorder %s849_s30, 0  ;;  %p144_p4 = scmp.eq.s32.totalorder %s849_s30, 15 }
  0x17   : > { %p1429_p5 = por %p67_p1, %p66_p0  ;;  %p150_p6 = scmp.eq.s32.totalorder %s850_s6, 15 }
  0x18   : > { %p1435_p7 = por %p1425_p3, %p72_p2  ;;  %p1439_p8 = por %p144_p4, %p66_p0 }
  0x19   : > { %p1443_p9 = por %p150_p6, %p72_p2  ;;  %p855_p10 = scmp.ge.s32.totalorder %s1323_s29, 1 }
  0x1a   : > { %s1774_s9 = scalar_select %p1435_p7, 1, 0 }
  0x1b   : > { %s1775_s10 = scalar_select %p1439_p8, 1, 0 }
  0x1c   : > { %s1777_s11 = scalar_select %p1443_p9, 1, 0 }
  0x1d   : > { %1776 = sst [smem:[#allocation20_spill]] %s1775_s10  ;;  %p185_p11 = scmp.lt.s32.totalorder %s1323_s29, 17 }
  0x1e   : > { %1778 = sst [smem:[#allocation21_spill]] %s1777_s11  ;;  %s1326_s13 = smov [#allocation8]  }
  0x1f   : > { %p1449_p12 = pnand %p855_p10, %p185_p11  ;;  %s201_s14 = sshll.u32 %s1326_s13, 4  ;;  %s202_s14 = int_to_ptr.vmem [resolvable:$true] %s201_s14 }
  0x20   : > { %p1036_p13 = scmp.lt.s32.totalorder %s1323_s29, 16  ;;  %s1162_s16 = scalar_lea.vmem %s202_s14, 16 }
  0x21   : > { %s1779_s12 = scalar_select %p1449_p12, 1, 0 }
  0x22   : > { %p1023_p1 = pneg %p1449_p12  ;;  %p1458_p0 = pnand %p1036_p13, %p1429_p5 }
  0x23   : > { %p1163_p6 = scmp.ne.s32.totalorder %s202_s14, %s1162_s16  ;;  %s1169_s17 = scalar_lea.vmem %s202_s14, 32 }
  0x24   : > { %p1024_p2 = pnand %p1023_p1, %p1425_p3  ;;  %p1170_p9 = scmp.lt.s32.totalorder %s202_s14, %s202_s14 }
  0x25   : > { %p1171_p8 = scmp.lt.s32.totalorder %s1169_s17, %s1162_s16 }
  0x26   : > { %p1153_p4 = pneg %p1024_p2 }
  0x27   : > { %p1172_p7 = por %p1171_p8, %p1170_p9 }
  0x28   : > { %p1165_p10 = pnand %p1163_p6, %p1153_p4 }
  0x2a   : > { %p1166_p11 = pneg %p1165_p10 }
  0x2c   : > { %p1173_p12 = pnand %p1172_p7, %p1166_p11 }
  0x2e   : > { %1176 = shalt.err (!%p1173_p12)
}
  0x2f   : > { %s1781_s3 = sld [smem:[#allocation23_spill]]  ;;  %s39_s20 = sadd.s32 1, %s1311_s0 }
  0x30   : > { %s42_s30 = sadd.s32 1, %s1315_s27  ;;  %p40_p5 = scmp.ge.s32.totalorder %s39_s20, 2 }
  0x31   : > { %s851_s6 = sshll.u32 %s1319_s28, 1  ;;  %s212_s13 = sand.u32 1, %s1295_s23  }
  0x32   : > { %s51_s8 = sadd.s32 %s1311_s0, %s851_s6  ;;  %s1805_s20 = smov (%p40_p5, %s39_s20), 0 }
  0x33   : > { %s1807_s30 = smov (!%p40_p5, %s42_s30), %s1315_s27  ;;  %s46_s16 = sadd.s32 1, %s1319_s28 }
  0x34   : > { %s1010_s17 = smul.u32 160, %s212_s13  ;;  %p44_p7 = scmp.ge.s32.totalorder %s1807_s30, 4 }
  0x35   : > { %1026 = dma.hbm_to_vmem [thread:$0]  (!%p1024_p2), %s1781_s3, 16, %s202_s14, [#allocation9]  }
  0x36   : > { %s908_s18 = smul.u32 20, %s51_s8  ;;  %s1809_s30 = smov (%p44_p7, %s1807_s30), 0 }
  0x37   : > { %s1011_s19 = smul.u32 80, %s1315_s27  ;;  %s1811_s16 = smov (!%p44_p7, %s46_s16), %s1319_s28 }
  0x38   : > { %p48_p8 = scmp.ge.s32.totalorder %s1811_s16, 2  ;;  %s216_s3 = scalar_lea.vmem [#allocation5], %s1010_s17 }
  0x39   : > { %s225_s14 = sadd.s32 %s1011_s19, %s908_s18  ;;  %s228_s0 = sshll.u32 %s216_s3, 4  ;;  %s229_s0 = int_to_ptr.vmem [resolvable:$true] %s228_s0 }
  0x3a   : > { %s860_s6 = sshll.u32 %s225_s14, 7  ;;  %s1813_s16 = smov (%p48_p8, %s1811_s16), 0 }
  0x3b   : > { %s54_s11 = ssub.s32 %s1315_s27, %s1809_s30  ;;  %s1487_s4 = scalar_lea.hbm %s1745_s1, %s860_s6 }
  0x3c   : > { %s852_s10 = sshll.u32 %s1813_s16, 1  ;;  %s59_s28 = sadd.s32 1, %s1295_s23 }
  0x3d   : > { %s53_s2 = sadd.s32 %s852_s10, %s1805_s20  ;;  %s213_s19 = scalar_lea.sflag [#allocation6], %s212_s13 }
  0x3e   : > { %s55_s24 = ssub.s32 %s51_s8, %s53_s2  ;;  %p1179_p12 = pneg %p1458_p0 }
  0x3f   : > { %s56_s18 = sor.u32 %s55_s24, %s54_s11  ;;  %s1190_s3 = scalar_lea.vmem %s229_s0, 2560 }
  0x40   : > { %p57_p9 = scmp.eq.s32.totalorder %s56_s18, 0  ;;  %p1191_p13 = scmp.ne.s32.totalorder %s229_s0, %s1190_s3 }
  0x41   : > { %s1327_s17 = smov [#allocation5]  }
  0x42   : > { %p1193_p1 = pnand %p1191_p13, %p1179_p12  ;;  %s1195_s14 = sshll.u32 %s1327_s17, 4  ;;  %s1196_s14 = int_to_ptr.vmem [resolvable:$false] %s1195_s14 }
  0x43   : > { %s1197_s21 = scalar_lea.vmem %s1196_s14, 5120  ;;  %p1198_p4 = scmp.lt.s32.totalorder %s229_s0, %s1196_s14 }
  0x44   : > { %p1194_p2 = pneg %p1193_p1  ;;  %p1199_p6 = scmp.lt.s32.totalorder %s1197_s21, %s1190_s3 }
  0x46   : > { %p1200_p10 = por %p1199_p6, %p1198_p4 }
  0x48   : > { %p1201_p11 = pnand %p1200_p10, %p1194_p2 }
  0x4a   : > { %1204 = shalt.err (!%p1201_p11)
}
  0x4b   : > { %s1328_s2 = smov 256   ;;  %s1329_s24 = smov 16  }
  0x4c   : > { %1030 = dma.hbm_to_vmem [thread:$0]  (!%p1458_p0), %s1487_s4, 2560, %s229_s0, %s213_s19, %s1328_s2, %s1328_s2, %s1329_s24  }
  0x4d   : > { %s1499_s29 = scalar_select %p57_p9, %s1295_s23, %s59_s28  }
  0x4e   : > { %p1782_p5 = scmp.ne.s32.totalorder %s1779_s12, 0 }
  0x4f   : > { %s1504_s10 = sand.u32 (!%p1782_p5), 1, %s1291_s22   ;;  %p1783_p7 = scmp.ne.s32.totalorder (!%p1782_p5), %s1774_s9, 0 }
  0x50   : > { %240 = sbr.rel (%p1782_p5) target bundleno = 425 (0x1a9), region = 32  ;;  %s243_s8 = scalar_lea.sflag (!%p1782_p5), [#allocation6], %s1504_s10 }
  0x51   : > { %s1012_s11 = smul.u32 (!%p1782_p5), 160, %s1504_s10 }
  0x53   : > { %s1508_s13 = scalar_lea.vmem (!%p1782_p5), [#allocation5], %s1012_s11 }
  0x55   : > { %1274 = dma.done.wait (%p1783_p7), %s243_s8, 2560  }
  0x56   : > { %1276 = vsyncadd (%p1783_p7), %s243_s8, 4294964736 }
  0x57   : > { %1278 = dma.done.wait (%p1425_p3), [#allocation9], 16  }
  0x58   : > { %1280 = vsyncadd (%p1425_p3), [#allocation9], 4294967280  ;;  %s1013_s4 = smul.u32 40, %s1504_s10  ;;  %p288_p0 = scmp.lt.s32.totalorder %s1303_s25, 3 }
  0x59   : > { %p290_p8 = scmp.lt.s32.totalorder %s1307_s26, 1  ;;  %s1784_s19 = sld [smem:[#allocation16_spill]] }
  0x5a   : > { %s289_s0 = scalar_select %p288_p0, %s1303_s25, 3 }
  0x5b   : > { %s291_s28 = scalar_select %p290_p8, %s1307_s26, 1 }
  0x5c   : > { %s863_s12 = sshll.u32 %s289_s0, 1  ;;  %s1529_s7 = scalar_lea.vmem [#allocation10], %s1013_s4 }
  0x5d   : > { %s1523_s15 = sadd.s32 %s863_s12, %s291_s28 }
  0x5e   : > { %s294_s18 = scalar_lea.vmem %s1749_s5, %s1523_s15 }
  0x5f   : > { %p864_p3 = scmp.ne.s32.totalorder %s1784_s19, 0 }
  0x61   : > { %299 = sbr.rel (%p864_p3) target bundleno = 104 (0x68), region = 44 }
  0x66   : > { %v1330_v0 = vmov 0.0  }
  0x67   : > { %300 = vst [vmem:[#allocation2] sm:$0x1] %v1330_v0 }
  0x68 PF: > { %s1785_s14 = sld [smem:[#allocation22_spill]]  ;;  %v302_v12 = vld [vmem:[%s1508_s13 + $0x8] sm:$0xff]  ;;  %v304_v13 = vld [vmem:[%s1508_s13 + $0x18] sm:$0xff]  ;;  %v301_v23 = vld [vmem:[%s1508_s13] sm:$0xff]  ;;  %s892_s11 = sshll.u32 %s1307_s26, 1  ;;  %v592_v47 = vlaneseq }
  0x69   : > { %v322_v14 = vpack.c.bf16 %v304_v13, %v302_v12  ;;  %v314_v15 = vld [vmem:[%s1508_s13 + $0x68] sm:$0xff]  ;;  %v316_v17 = vld [vmem:[%s1508_s13 + $0x78] sm:$0xff]  ;;  %v303_v24 = vld [vmem:[%s1508_s13 + $0x10] sm:$0xff]  ;;  %s1786_s24 = sld [smem:[#allocation16_spill]] }
  0x6a   : > { %v328_v19 = vpack.c.bf16 %v316_v17, %v314_v15  ;;  %v306_v25 = vld [vmem:[%s1508_s13 + $0x28] sm:$0xff]  ;;  %v313_v26 = vld [vmem:[%s1508_s13 + $0x60] sm:$0xff]  ;;  %v315_v27 = vld [vmem:[%s1508_s13 + $0x70] sm:$0xff]  ;;  %v321_v31 = vpack.c.bf16 %v303_v24, %v301_v23  ;;  %s614_s4 = sld [smem:[#allocation4 + %s1303_s25]]  ;;  %v1606_v50 = vshrl.u32 %v592_v47, 7  ;;  %v1331_v24 = vmov 0.0  }
  0x6b   : > { %498 = vmatprep.mubr.bf16.mxu0 %v322_v14  ;;  %v308_v28 = vld [vmem:[%s1508_s13 + $0x38] sm:$0xff]  ;;  %v318_v29 = vld [vmem:[%s1508_s13 + $0x88] sm:$0xff]  ;;  %v327_v32 = vpack.c.bf16 %v315_v27, %v313_v26  ;;  %v305_v35 = vld [vmem:[%s1508_s13 + $0x20] sm:$0xff] }
  0x6c   : > { %522 = vmatprep.mubr.bf16.mxu1 %v328_v19  ;;  %v320_v30 = vld [vmem:[%s1508_s13 + $0x98] sm:$0xff]  ;;  %v324_v33 = vpack.c.bf16 %v308_v28, %v306_v25  ;;  %v307_v36 = vld [vmem:[%s1508_s13 + $0x30] sm:$0xff]  ;;  %v317_v37 = vld [vmem:[%s1508_s13 + $0x80] sm:$0xff]  ;;  %v594_v54 = vadd.s32 8, %v1606_v50  ;;  %v595_v59 = vadd.s32 16, %v1606_v50  ;;  %v596_v0 = vadd.s32 24, %v1606_v50 }
  0x6d   : > { %v330_v34 = vpack.c.bf16 %v320_v30, %v318_v29  ;;  %v319_v38 = vld [vmem:[%s1508_s13 + $0x90] sm:$0xff]  ;;  %v310_v39 = vld [vmem:[%s1508_s13 + $0x48] sm:$0xff]  ;;  %v312_v40 = vld [vmem:[%s1508_s13 + $0x58] sm:$0xff]  ;;  %v323_v41 = vpack.c.bf16 %v307_v36, %v305_v35  ;;  %v598_v23 = vadd.s32 40, %v1606_v50  ;;  %v599_v27 = vadd.s32 48, %v1606_v50 }
  0x6e   : > { %v1127_v1 = vld [vmem:[%s1785_s14 + $0x78] sm:$0xff]   ;;  %v1129_v3 = vld [vmem:[%s1785_s14 + $0x70] sm:$0xff]   ;;  %v1131_v5 = vld [vmem:[%s1785_s14 + $0x68] sm:$0xff]   ;;  %v329_v42 = vpack.c.bf16 %v319_v38, %v317_v37  ;;  %v326_v43 = vpack.c.bf16 %v312_v40, %v310_v39  ;;  %v600_v36 = vadd.s32 56, %v1606_v50 }
  0x6f   : > { %v1128_v2 = vld [vmem:[%s1785_s14 + $0x38] sm:$0xff]   ;;  %948 = vmatprep.subr.bf16.mxu0 %v1127_v1  ;;  %994 = vmatprep.subr.bf16.mxu1 %v1127_v1  ;;  %v1130_v4 = vld [vmem:[%s1785_s14 + $0x30] sm:$0xff]   ;;  %v1132_v6 = vld [vmem:[%s1785_s14 + $0x28] sm:$0xff]   ;;  %s1602_s8 = sadd.s32 %s1786_s24, %s892_s11  ;;  %p903_p9 = scmp.ne.s32.totalorder %s1786_s24, 1 }
  0x70   : > { %949 = vmatpush3.bf16.msra.mxu0 %v1128_v2  ;;  %1002 = vmatpush3.bf16.msra.mxu1 %v1128_v2  ;;  %v1133_v7 = vld [vmem:[%s1785_s14 + $0x60] sm:$0xff]   ;;  %v1135_v9 = vld [vmem:[%s1785_s14 + $0x58] sm:$0xff]   ;;  %v1137_v11 = vld [vmem:[%s1785_s14 + $0x50] sm:$0xff]   ;;  %s591_s0 = smul.u32 80, %s1602_s8  ;;  %v1616_v62 = vstv %s614_s4 }
  0x71   : > { %950 = vmatprep.subr.bf16.mxu0 %v1129_v3  ;;  %995 = vmatprep.subr.bf16.mxu1 %v1129_v3  ;;  %v1134_v8 = vld [vmem:[%s1785_s14 + $0x20] sm:$0xff]   ;;  %v1136_v10 = vld [vmem:[%s1785_s14 + $0x18] sm:$0xff]   ;;  %v1138_v16 = vld [vmem:[%s1785_s14 + $0x10] sm:$0xff]  }
  0x72   : > { %v1139_v18 = vld [vmem:[%s1785_s14 + $0x48] sm:$0xff]   ;;  %v1141_v21 = vld [vmem:[%s1785_s14 + $0x40] sm:$0xff]   ;;  %v311_v45 = vld [vmem:[%s1508_s13 + $0x50] sm:$0xff]  ;;  %v1608_v53 = vstv %s591_s0 }
  0x73   : > { %v1140_v20 = vld [vmem:[%s1785_s14 + $0x8] sm:$0xff]   ;;  %v1142_v22 = vld [vmem:[%s1785_s14] sm:$0xff]   ;;  %v604_v61 = vadd.s32 %v1608_v53, %v1606_v50  ;;  %v605_v3 = vadd.s32 %v1608_v53, %v594_v54  ;;  %v607_v14 = vadd.s32 %v1608_v53, %v596_v0  ;;  %v609_v39 = vadd.s32 %v1608_v53, %v598_v23 }
  0x74   : > { %951 = vmatpush3.bf16.msra.mxu0 %v1130_v4  ;;  %1003 = vmatpush3.bf16.msra.mxu1 %v1130_v4  ;;  %v309_v44 = vld [vmem:[%s1508_s13 + $0x40] sm:$0xff] }
  0x75   : > { %952 = vmatprep.subr.bf16.mxu0 %v1131_v5  ;;  %996 = vmatprep.subr.bf16.mxu1 %v1131_v5  ;;  %v325_v46 = vpack.c.bf16 %v311_v45, %v309_v44  ;;  %v1612_v60 = vld [vmem:[#allocation8] ss:$0 sm:$0xff]  ;;  %vm616_vm0 = vcmp.lt.s32.totalorder %v604_v61, %v1616_v62  ;;  %vm617_vm1 = vcmp.lt.s32.totalorder %v605_v3, %v1616_v62  ;;  %v601_v45 = vadd.s32 64, %v1606_v50 }
  0x76   : > { %v893_v25 = vsel %vm616_vm0, 1.0, %v1331_v24  ;;  %v894_v26 = vsel %vm617_vm1, 1.0, %v1331_v24  ;;  %vm619_vm3 = vcmp.lt.s32.totalorder %v607_v14, %v1616_v62  ;;  %vm621_vm5 = vcmp.lt.s32.totalorder %v609_v39, %v1616_v62 }
  0x77   : > { %v612_v0 = vadd.s32 %v1608_v53, %v601_v45 }
  0x78   : > { %953 = vmatpush3.bf16.msra.mxu0 %v1132_v6  ;;  %1004 = vmatpush3.bf16.msra.mxu1 %v1132_v6 }
  0x79   : > { %954 = vmatprep.subr.bf16.mxu0 %v1133_v7  ;;  %997 = vmatprep.subr.bf16.mxu1 %v1133_v7  ;;  %v597_v7 = vadd.s32 32, %v1606_v50  ;;  %vm624_vm8 = vcmp.lt.s32.totalorder %v612_v0, %v1616_v62 }
  0x7a   : > { %v901_v14 = vsel %vm624_vm8, 1.0, %v1331_v24 }
  0x7c   : > { %955 = vmatpush3.bf16.msra.mxu0 %v1134_v8  ;;  %1005 = vmatpush3.bf16.msra.mxu1 %v1134_v8 }
  0x7d   : > { %956 = vmatprep.subr.bf16.mxu0 %v1135_v9  ;;  %998 = vmatprep.subr.bf16.mxu1 %v1135_v9 }
  0x80   : > { %957 = vmatpush3.bf16.msra.mxu0 %v1136_v10  ;;  %1006 = vmatpush3.bf16.msra.mxu1 %v1136_v10 }
  0x81   : > { %958 = vmatprep.subr.bf16.mxu0 %v1137_v11  ;;  %999 = vmatprep.subr.bf16.mxu1 %v1137_v11  ;;  %v606_v11 = vadd.s32 %v1608_v53, %v595_v59 }
  0x83   : > { %vm618_vm2 = vcmp.lt.s32.totalorder %v606_v11, %v1616_v62 }
  0x84   : > { %959 = vmatpush3.bf16.msra.mxu0 %v1138_v16  ;;  %1007 = vmatpush3.bf16.msra.mxu1 %v1138_v16 }
  0x85   : > { %960 = vmatprep.subr.bf16.mxu0 %v1139_v18  ;;  %1000 = vmatprep.subr.bf16.mxu1 %v1139_v18 }
  0x88   : > { %961 = vmatpush3.bf16.msra.mxu0 %v1140_v20  ;;  %1008 = vmatpush3.bf16.msra.mxu1 %v1140_v20  ;;  %v608_v20 = vadd.s32 %v1608_v53, %v597_v7 }
  0x89   : > { %962 = vmatprep.subr.bf16.mxu0 %v1141_v21  ;;  %1001 = vmatprep.subr.bf16.mxu1 %v1141_v21 }
  0x8a   : > { %vm620_vm4 = vcmp.lt.s32.totalorder %v608_v20, %v1616_v62 }
  0x8c   : > { %963 = vmatpush3.bf16.msra.mxu0 %v1142_v22  ;;  %1009 = vmatpush3.bf16.msra.mxu1 %v1142_v22 }
  0x8f   : > { %499 = vmatmul.mubr.bf16.vlgmr.msra.gmra.mxu0 %v321_v31  ;;  %523 = vmatmul.mubr.bf16.vlgmr.msra.gmra.mxu1 %v327_v32 }
  0x90   : > { %506 = vmatprep.mubr.bf16.mxu0 %v324_v33  ;;  %530 = vmatprep.mubr.bf16.mxu1 %v330_v34  ;;  %v895_v34 = vsel %vm618_vm2, 1.0, %v1331_v24 }
  0x97   : > { %507 = vmatmul.mubr.bf16.gmra.mxu0 %v323_v41  ;;  %531 = vmatmul.mubr.bf16.gmra.mxu1 %v329_v42  ;;  %v610_v42 = vadd.s32 %v1608_v53, %v599_v27 }
  0x98   : > { %514 = vmatprep.mubr.bf16.mxu0 %v326_v43  ;;  %v896_v43 = vsel %vm619_vm3, 1.0, %v1331_v24 }
  0x99   : > { %vm622_vm6 = vcmp.lt.s32.totalorder %v610_v42, %v1616_v62 }
  0x9f   : > { %515 = vmatmul.mubr.bf16.gmra.mxu0 %v325_v46 }
 0x14f   : > { %v964_v48 = vpop.f32.mrf.mxu0  ;;  %v982_v49 = vpop.f32.mrf.mxu1 }
 0x151   : > { %v965_v51 = vpop.f32.mrf.mxu0  ;;  %v983_v52 = vpop.f32.mrf.mxu1 }
 0x152   : > { %v984_v55 = vadd.f32 %v983_v52, %v982_v49  ;;  %v966_v58 = vadd.f32 %v965_v51, %v964_v48  ;;  %v611_v51 = vadd.s32 %v1608_v53, %v600_v36  ;;  %v897_v52 = vsel %vm620_vm4, 1.0, %v1331_v24 }
 0x153   : > { %v967_v56 = vpop.f32.mrf.mxu0  ;;  %v985_v57 = vpop.f32.mrf.mxu1 }
 0x154   : > { %v1621_v4 = vadd.f32 %v984_v55, %v1612_v60  ;;  %v501_v9 = vadd.f32 %v966_v58, %v1612_v60  ;;  %v602_v55 = vadd.s32 72, %v1606_v50  ;;  %vm623_vm7 = vcmp.lt.s32.totalorder %v611_v51, %v1616_v62 }
 0x155   : > { %v968_v63 = vpop.f32.mrf.mxu0  ;;  %v986_v1 = vpop.f32.mrf.mxu1 }
 0x156   : > { %v969_v2 = vadd.f32 %v968_v63, %v967_v56  ;;  %v987_v5 = vadd.f32 %v986_v1, %v985_v57  ;;  %v647_v41 = vmul.f32 %v893_v25, %v501_v9 }
 0x157   : > { %v970_v6 = vpop.f32.mrf.mxu0  ;;  %v988_v8 = vpop.f32.mrf.mxu1 }
 0x158   : > { %v504_v10 = vadd.f32 %v969_v2, %v1612_v60  ;;  %v1628_v12 = vadd.f32 %v987_v5, %v1612_v60  ;;  %v898_v2 = vsel %vm621_vm5, 1.0, %v1331_v24  ;;  %v613_v5 = vadd.s32 %v1608_v53, %v602_v55 }
 0x159   : > { %v971_v13 = vpop.f32.mrf.mxu0  ;;  %v989_v15 = vpop.f32.mrf.mxu1 }
 0x15a   : > { %v922_v16 = vpack.c.bf16 %v504_v10, %v501_v9  ;;  %v972_v17 = vadd.f32 %v971_v13, %v970_v6  ;;  %v937_v18 = vpack.c.bf16 %v1628_v12, %v1621_v4  ;;  %v990_v21 = vadd.f32 %v989_v15, %v988_v8 }
 0x15b   : > { %v973_v19 = vpop.f32.mrf.mxu0  ;;  %v991_v22 = vpop.f32.mrf.mxu1  ;;  %v648_v37 = vmul.f32 %v894_v26, %v504_v10  ;;  %v899_v6 = vsel %vm622_vm6, 1.0, %v1331_v24  ;;  %v900_v10 = vsel %vm623_vm7, 1.0, %v1331_v24  ;;  %vm625_vm9 = vcmp.lt.s32.totalorder %v613_v5, %v1616_v62 }
 0x15c   : > { %923 = vst [vmem:[%s1529_s7] sm:$0xff] %v922_v16   ;;  %946 = vst [vmem:[%s1529_s7 + $0x18] sm:$0xff] %v937_v18   ;;  %v509_v30 = vadd.f32 %v972_v17, %v1612_v60  ;;  %v533_v32 = vadd.f32 %v990_v21, %v1612_v60  ;;  %v653_v11 = vmul.f32 %v899_v6, %v1621_v4  ;;  %v646_v4 = vld [vmem:[#allocation2] sm:$0x1] }
 0x15d   : > { %v974_v28 = vpop.f32.mrf.mxu0  ;;  %v992_v29 = vpop.f32.mrf.mxu1  ;;  %v657_v56 = vadd.f32 %v648_v37, %v647_v41  ;;  %v654_v15 = vmul.f32 %v900_v10, %v1628_v12 }
 0x15e   : > { %v975_v31 = vadd.f32 %v974_v28, %v973_v19  ;;  %v993_v33 = vadd.f32 %v992_v29, %v991_v22  ;;  %v649_v46 = vmul.f32 %v895_v34, %v509_v30  ;;  %v655_v17 = vmul.f32 %v901_v14, %v533_v32 }
 0x15f   : > { %v976_v35 = vpop.f32.mrf.mxu0 }
 0x160   : > { %v512_v38 = vadd.f32 %v975_v31, %v1612_v60  ;;  %v536_v40 = vadd.f32 %v993_v33, %v1612_v60  ;;  %v658_v61 = vadd.f32 %v657_v56, %v649_v46 }
 0x161   : > { %v977_v44 = vpop.f32.mrf.mxu0 }
 0x162   : > { %v927_v47 = vpack.c.bf16 %v512_v38, %v509_v30  ;;  %v978_v48 = vadd.f32 %v977_v44, %v976_v35  ;;  %v942_v49 = vpack.c.bf16 %v536_v40, %v533_v32  ;;  %v650_v57 = vmul.f32 %v896_v43, %v512_v38 }
 0x163   : > { %v979_v54 = vpop.f32.mrf.mxu0 }
 0x164   : > { %944 = vst [vmem:[%s1529_s7 + $0x8] sm:$0xff] %v927_v47   ;;  %v517_v58 = vadd.f32 %v978_v48, %v1612_v60  ;;  %947 = vst [vmem:[%s1529_s7 + $0x20] sm:$0xff] %v942_v49   ;;  %v659_v3 = vadd.f32 %v658_v61, %v650_v57 }
 0x165   : > { %v980_v59 = vpop.f32.mrf.mxu0 }
 0x166   : > { %v651_v63 = vmul.f32 %v897_v52, %v517_v58  ;;  %v981_v1 = vadd.f32 %v980_v59, %v979_v54 }
 0x168   : > { %v520_v50 = vadd.f32 %v981_v1, %v1612_v60  ;;  %v660_v7 = vadd.f32 %v659_v3, %v651_v63  ;;  %v902_v60 = vsel %vm625_vm9, 1.0, %v1331_v24 }
 0x169   : > { %v656_v18 = vmul.f32 %v902_v60, %v536_v40 }
 0x16a   : > { %v932_v8 = vpack.c.bf16 %v520_v50, %v517_v58  ;;  %v652_v9 = vmul.f32 %v898_v2, %v520_v50 }
 0x16c   : > { %945 = vst [vmem:[%s1529_s7 + $0x10] sm:$0xff] %v932_v8   ;;  %v661_v13 = vadd.f32 %v660_v7, %v652_v9 }
 0x16e   : > { %v662_v16 = vadd.f32 %v661_v13, %v653_v11 }
 0x170   : > { %v663_v53 = vadd.f32 %v662_v16, %v654_v15 }
 0x172   : > { %v664_v19 = vadd.f32 %v663_v53, %v655_v17 }
 0x174   : > { %v665_v20 = vadd.f32 %v664_v19, %v656_v18 }
 0x176   : > { %v666_v21 = vrot.slane %v665_v20, 4 }
 0x178   : > { %v667_v22 = vadd.f32 %v666_v21, %v665_v20 }
 0x17a   : > { %v668_v23 = vrot.slane %v667_v22, 2 }
 0x17c   : > { %v669_v25 = vadd.f32 %v668_v23, %v667_v22 }
 0x17e   : > { %v670_v26 = vrot.slane %v669_v25, 1 }
 0x180   : > { %v671_v27 = vadd.f32 %v670_v26, %v669_v25  ;;  %677 = sbr.rel (%p903_p9) target bundleno = 397 (0x18d), region = 48 }
 0x182   : > { %v672_v28 = vadd.f32 %v671_v27, %v646_v4 }
 0x184   : > { %673 = vst [vmem:[#allocation2] sm:$0x1] %v672_v28 }
 0x18b   : > { %v678_v62 = vld [vmem:[#allocation2] sm:$0x1] }
 0x18c   : > { %679 = vst [vmem:[%s294_s18] sm:$0x1] %v678_v62 }
 0x18d PF: > { %s1787_s28 = sld [smem:[#allocation20_spill]]  ;;  %s697_s12 = smul.u32 10, %s1602_s8 }
 0x18e   : > { %s1014_s9 = smul.u32 40, %s1303_s25  ;;  %s705_s6 = sshll.u32 %s1529_s7, 4  ;;  %s1680_s6 = int_to_ptr.vmem [resolvable:$true] %s705_s6 }
 0x18f   : > { %s1788_s15 = sld [smem:[#allocation24_spill]]  ;;  %s681_s2 = scalar_lea.sflag [#allocation7], %s1504_s10 }
 0x190   : > { %s702_s19 = sadd.s32 %s1014_s9, %s697_s12  ;;  %s1205_s24 = scalar_lea.vmem %s1680_s6, 640 }
 0x191   : > { %s905_s3 = sshll.u32 %s702_s19, 6  ;;  %p1206_p12 = scmp.ne.s32.totalorder %s1680_s6, %s1205_s24 }
 0x192   : > { %s1332_s25 = smov [#allocation10]  }
 0x193   : > { %p1789_p13 = scmp.ne.s32.totalorder %s1787_s28, 0  ;;  %s1209_s7 = sshll.u32 %s1332_s25, 4  ;;  %s1210_s7 = int_to_ptr.vmem [resolvable:$false] %s1209_s7 }
 0x194   : > { %s1211_s11 = scalar_lea.vmem %s1210_s7, 1280  ;;  %p1212_p4 = scmp.lt.s32.totalorder %s1680_s6, %s1210_s7 }
 0x195   : > { %s1685_s18 = scalar_lea.hbm %s1788_s15, %s905_s3  ;;  %p1207_p1 = pnand %p1206_p12, %p1789_p13 }
 0x196   : > { %p1213_p6 = scmp.lt.s32.totalorder %s1211_s11, %s1205_s24 }
 0x197   : > { %p1208_p2 = pneg %p1207_p1 }
 0x198   : > { %p1214_p10 = por %p1213_p6, %p1212_p4 }
 0x19a   : > { %p1215_p11 = pnand %p1214_p10, %p1208_p2 }
 0x19c   : > { %1218 = shalt.err (!%p1215_p11)
}
 0x19d   : > { %s1219_s8 = scalar_lea.hbm %s1685_s18, 640  ;;  %s1223_s26 = scalar_lea.hbm %s1788_s15, 10240 }
 0x19e   : > { %p1220_p5 = scmp.ne.s32.totalorder %s1685_s18, %s1219_s8  ;;  %p1224_p8 = scmp.lt.s32.totalorder %s1685_s18, %s1788_s15 }
 0x19f   : > { %p1225_p3 = scmp.lt.s32.totalorder %s1223_s26, %s1219_s8 }
 0x1a0   : > { %p1221_p7 = pnand %p1220_p5, %p1789_p13 }
 0x1a1   : > { %p1226_p9 = por %p1225_p3, %p1224_p8 }
 0x1a2   : > { %p1222_p0 = pneg %p1221_p7 }
 0x1a4   : > { %p1227_p12 = pnand %p1226_p9, %p1222_p0 }
 0x1a6   : > { %1230 = shalt.err (!%p1227_p12)
}
 0x1a7   : > { %s1333_s9 = smov 64   ;;  %s1334_s19 = smov 4  }
 0x1a8   : > { %1021 = dma.vmem_to_hbm [thread:$0]  (%p1789_p13), %s1680_s6, 640, %s1685_s18, %s681_s2, %s1333_s9, %s1333_s9, %s1334_s19  }
 0x1a9 PF: > { %s1790_s3 = sld [smem:[#allocation19_spill]] }
 0x1aa   : > { %s1791_s17 = sld [smem:[#allocation15_spill]] }
 0x1ab   : > { %s1792_s21 = sld [smem:[#allocation21_spill]] }
 0x1af   : > { %p1038_p1 = scmp.ge.s32.totalorder %s1790_s3, 2 }
 0x1b0   : > { %s723_s24 = sand.u32 1, %s1791_s17  }
 0x1b1   : > { %p1793_p2 = scmp.ne.s32.totalorder %s1792_s21, 0  ;;  %s724_s25 = scalar_lea.sflag [#allocation7], %s723_s24 }
 0x1b3   : > { %p1032_p4 = pnand %p1038_p1, %p1793_p2 }
 0x1b5   : > { %p1033_p6 = pneg %p1032_p4 }
 0x1b7   : > { %1282 = dma.done.wait (%p1033_p6), %s724_s25, 640  }
 0x1b8   : > { %1284 = vsyncadd (%p1033_p6), %s724_s25, 4294966656  ;;  %s27_s7 = sadd.s32 1, %s1790_s3   ;;  %s1794_s24 = sld [smem:[#allocation17_spill]] }
 0x1b9   : > { %p24_p10 = scmp.ge.s32.totalorder %s27_s7, 18   ;;  %s1795_s26 = sld [smem:[#allocation18_spill]] }
 0x1ba   : > { %s1796_s21 = smov %s1291_s22  ;;  %s1797_s22 = smov %s1295_s23 }
 0x1bb   : > { %s1798_s23 = smov %s1499_s29  ;;  %s1799_s25 = smov %s1315_s27 }
 0x1bc   : > { %s1800_s0 = smov %s1805_s20  ;;  %s1801_s27 = smov %s1809_s30 }
 0x1bd   : > { %s1802_s28 = smov %s1813_s16  ;;  %s1803_s29 = smov %s27_s7 }
 0x1be   :  { %26 = sbr.rel (!%p24_p10) target bundleno = 17 (0x11), region = 101 }
 0x1c3   :  { %739 = vsyncpa [#allocation6], 1 }
 0x1c4   :  { %741 = vsyncpa [#allocation6 + $0x1], 1 }
 0x1c5   :  { %742 = vsyncpa [#allocation9], 1 }
 0x1c6   :  { %743 = vsyncpa [#allocation7], 1 }
 0x1c7   :  { %745 = vsyncpa [#allocation7 + $0x1], 1 }

</bundles_post_ra>
